<compile_context>
chip_gen: v7x
topology: tpu7x:2x2x1
jax: 0.10.0
libtpu: 0.0.40
codegen_flags: <defaults>
</compile_context>

<pallas_src>
import functools

import jax
import jax.numpy as jnp
from jax.experimental import pallas as pl
from jax.experimental.pallas import tpu as pltpu


def _ce2d_kernel(x_ref, t_ref, o_ref, *, num_classes, hw, tr, needs_mask):
    """One grid step.

    x_ref: (1, C, TR, 128) logits block, native dtype.
    t_ref: (1, TR, 128)    int32 targets block.
    o_ref: (1, 1, 8, 128)  f32 partial-sum block owned by this (i, j) cell.
    """
    j = pl.program_id(1)

    if needs_mask:
        # Flat pixel index of each (row, lane) element of this block.
        row = jax.lax.broadcasted_iota(jnp.int32, (tr, 128), 0) + j * tr
        lane = jax.lax.broadcasted_iota(jnp.int32, (tr, 128), 1)
        valid = (row * 128 + lane) < hw
    else:
        valid = None

    # Pass 1: running max over classes -- elementwise over dense (TR, 128)
    # tiles (class axis is a leading dim, so no sublane/XLU reduction).
    xm = x_ref[0, 0]
    for c in range(1, num_classes):
        xm = jnp.maximum(xm, x_ref[0, c])
    m = xm.astype(jnp.float32)
    if needs_mask:
        m = jnp.where(valid, m, 0.0)  # keep masked lanes finite

    # Pass 2: sum of exp and target-logit select, one dense class row at a time.
    t = t_ref[0]                                   # (TR, 128) int32
    s = jnp.zeros((tr, 128), jnp.float32)          # softmax denominator
    sel = jnp.zeros((tr, 128), jnp.float32)        # target-class logit
    for c in range(num_classes):
        xc = x_ref[0, c].astype(jnp.float32)
        if needs_mask:
            xc = jnp.where(valid, xc, 0.0)
        s = s + jnp.exp(xc - m)
        sel = jnp.where(t == c, xc, sel)

    nll = m + jnp.log(s) - sel                     # (TR, 128)
    if needs_mask:
        nll = jnp.where(valid, nll, 0.0)

    # Reduce (TR, 128) -> (8, 128) with pure vreg adds (reshape is tile-aligned,
    # the leading-axis sum is elementwise -- no cross-lane / XLU work).
    o_ref[0, 0] = jnp.sum(nll.reshape(tr // 8, 8, 128), axis=0)


def cross_entropy_loss_2d(outputs, targets, *, tile_budget_bytes=4 * 1024 * 1024):
    """outputs: (N, C, H, W) float logits; targets: (N, H, W) int class ids.

    Returns scalar mean NLL(log_softmax(outputs, dim=1), targets), weight=None.
    """
    N, C, H, W = outputs.shape
    HW = H * W

    # Flatten spatial and pad to a multiple of 8*128 so every block is
    # sublane/lane dense.  For typical segmentation shapes (H, W multiples of
    # 32) the pad is zero and these reshapes are free (no extra HBM pass).
    hw_pad = ((HW + 1023) // 1024) * 1024
    pad = hw_pad - HW

    x = outputs.reshape(N, C, HW)
    t = targets.reshape(N, HW).astype(jnp.int32)
    if pad:
        x = jnp.pad(x, ((0, 0), (0, 0), (0, pad)))
        t = jnp.pad(t, ((0, 0), (0, pad)))
    R = hw_pad // 128
    xr = x.reshape(N, C, R, 128)
    tg = t.reshape(N, R, 128)

    # Pixel-tile rows per step: native-dtype logits block of ~tile_budget_bytes
    # (multiple of 8 sublanes, capped by the spatial extent).
    itemsize = jnp.dtype(outputs.dtype).itemsize
    tr_rows = tile_budget_bytes // (C * 128 * itemsize)
    tr_rows = max(8, (tr_rows // 8) * 8)
    tr_rows = min(tr_rows, R)
    nR = pl.cdiv(R, tr_rows)
    needs_mask = (nR * tr_rows * 128) != HW

    # Generation-aware VMEM limit: ~64 MiB on v5e/v6e (128 MiB physical),
    # ~48 MiB on v7x (64 MiB physical) to leave internal-scratch headroom.
    try:
        vmem_cap = int(pltpu.get_tpu_info().vmem_capacity_bytes)
    except Exception:
        vmem_cap = 64 * 1024 * 1024
    vmem_limit = int(min(max(vmem_cap - 16 * 1024 * 1024, 32 * 1024 * 1024),
                         64 * 1024 * 1024))

    kernel = functools.partial(
        _ce2d_kernel, num_classes=C, hw=HW, tr=tr_rows, needs_mask=needs_mask)

    x_bytes = int(N * C * hw_pad * itemsize)
    cost = pl.CostEstimate(
        flops=int(7 * N * C * HW),
        transcendentals=int(N * HW * (C + 1)),
        bytes_accessed=int(x_bytes + N * hw_pad * 4 + N * nR * 8 * 128 * 4),
    )

    partials = pl.pallas_call(
        kernel,
        out_shape=jax.ShapeDtypeStruct((N, nR, 8, 128), jnp.float32),
        grid_spec=pltpu.PrefetchScalarGridSpec(
            num_scalar_prefetch=0,
            grid=(N, nR),
            in_specs=[
                # Logits: class axis leading, dense (TR, 128) spatial tile.
                pl.BlockSpec((1, C, tr_rows, 128), lambda i, j: (i, 0, j, 0)),
                # Targets: dense (TR, 128) int32 tile.
                pl.BlockSpec((1, tr_rows, 128), lambda i, j: (i, j, 0)),
            ],
            # Each (i, j) owns its own tiny partial-sum block -> both axes parallel.
            out_specs=pl.BlockSpec((1, 1, 8, 128), lambda i, j: (i, j, 0, 0)),
        ),
        compiler_params=pltpu.CompilerParams(
            dimension_semantics=("parallel", "parallel"),
            vmem_limit_bytes=vmem_limit,
        ),
        cost_estimate=cost,
    )(xr, tg)

    # Final reduce + mean outside the kernel (N * nR * 8 * 128 floats: trivial).
    return jnp.sum(partials) / jnp.float32(N * HW)


def _reference(outputs, targets):
    # Pure-JAX reference: mean_{n,h,w} -log_softmax(outputs)[n, targets[n,h,w], h, w]
    logp = jax.nn.log_softmax(outputs.astype(jnp.float32), axis=1)   # (N, C, H, W)
    logp_nhwc = jnp.transpose(logp, (0, 2, 3, 1))                    # (N, H, W, C)
    picked = jnp.take_along_axis(
        logp_nhwc, targets[..., None].astype(jnp.int32), axis=-1
    )[..., 0]
    return -jnp.mean(picked)


if __name__ == "__main__":
    key = jax.random.PRNGKey(0)
    k1, k2 = jax.random.split(key)

    N, C, H, W = 2, 4, 16, 16
    outputs = jax.random.normal(k1, (N, C, H, W), dtype=jnp.float32)
    targets = jax.random.randint(k2, (N, H, W), 0, C, dtype=jnp.int32)

    loss = cross_entropy_loss_2d(outputs, targets)
    loss = jax.block_until_ready(loss)

    ref = jax.block_until_ready(_reference(outputs, targets))
    assert jnp.allclose(loss, ref, rtol=1e-5, atol=1e-5), (loss, ref)

    print("KERNEL_OK")
</pallas_src>

<mosaic_0001>
module attributes {stable_mosaic.version = 11 : i64} {
  func.func @_ce2d_kernel(%arg0: i32, %arg1: i32, %arg2: memref<1x4x8x128xf32, #tpu.memory_space<vmem>>, %arg3: memref<1x8x128xi32, #tpu.memory_space<vmem>>, %arg4: memref<1x1x8x128xf32, #tpu.memory_space<vmem>>) attributes {dimension_semantics = [#tpu.dimension_semantics<parallel>, #tpu.dimension_semantics<parallel>], iteration_bounds = array<i64: 2, 1>, scalar_prefetch = 0 : i64, scratch_operands = 0 : i64, tpu.core_type = #tpu.core_type<tc>, window_params = [{transform_indices = @transform_0, window_bounds = array<i64: 1, 4, 8, 128>}, {transform_indices = @transform_1, window_bounds = array<i64: 1, 8, 128>}, {transform_indices = @transform_2, window_bounds = array<i64: 1, 1, 8, 128>}]} {
    %0 = tpu.iota {dimensions = array<i32: 0>} : vector<8x128xi32>
    %c8_i32 = arith.constant 8 : i32
    %1 = arith.muli %arg1, %c8_i32 : i32
    %2 = vector.broadcast %1 : i32 to vector<8x128xi32>
    %3 = arith.addi %0, %2 : vector<8x128xi32>
    %4 = tpu.iota {dimensions = array<i32: 1>} : vector<8x128xi32>
    %c128_i32 = arith.constant 128 : i32
    %5 = vector.broadcast %c128_i32 : i32 to vector<8x128xi32>
    %6 = arith.muli %3, %5 : vector<8x128xi32>
    %7 = arith.addi %6, %4 : vector<8x128xi32>
    %c256_i32 = arith.constant 256 : i32
    %8 = vector.broadcast %c256_i32 : i32 to vector<8x128xi32>
    %9 = arith.cmpi slt, %7, %8 : vector<8x128xi32>
    %c0 = arith.constant 0 : index
    %c0_0 = arith.constant 0 : index
    %c0_1 = arith.constant 0 : index
    %c0_2 = arith.constant 0 : index
    %10 = vector.load %arg2[%c0, %c0_0, %c0_1, %c0_2] : memref<1x4x8x128xf32, #tpu.memory_space<vmem>>, vector<1x1x8x128xf32>
    %11 = vector.shape_cast %10 : vector<1x1x8x128xf32> to vector<8x128xf32>
    %c0_3 = arith.constant 0 : index
    %c1 = arith.constant 1 : index
    %c0_4 = arith.constant 0 : index
    %c0_5 = arith.constant 0 : index
    %12 = vector.load %arg2[%c0_3, %c1, %c0_4, %c0_5] : memref<1x4x8x128xf32, #tpu.memory_space<vmem>>, vector<1x1x8x128xf32>
    %13 = vector.shape_cast %12 : vector<1x1x8x128xf32> to vector<8x128xf32>
    %14 = arith.maximumf %11, %13 : vector<8x128xf32>
    %c0_6 = arith.constant 0 : index
    %c2 = arith.constant 2 : index
    %c0_7 = arith.constant 0 : index
    %c0_8 = arith.constant 0 : index
    %15 = vector.load %arg2[%c0_6, %c2, %c0_7, %c0_8] : memref<1x4x8x128xf32, #tpu.memory_space<vmem>>, vector<1x1x8x128xf32>
    %16 = vector.shape_cast %15 : vector<1x1x8x128xf32> to vector<8x128xf32>
    %17 = arith.maximumf %14, %16 : vector<8x128xf32>
    %c0_9 = arith.constant 0 : index
    %c3 = arith.constant 3 : index
    %c0_10 = arith.constant 0 : index
    %c0_11 = arith.constant 0 : index
    %18 = vector.load %arg2[%c0_9, %c3, %c0_10, %c0_11] : memref<1x4x8x128xf32, #tpu.memory_space<vmem>>, vector<1x1x8x128xf32>
    %19 = vector.shape_cast %18 : vector<1x1x8x128xf32> to vector<8x128xf32>
    %20 = arith.maximumf %17, %19 : vector<8x128xf32>
    %cst = arith.constant 0.000000e+00 : f32
    %21 = vector.broadcast %cst : f32 to vector<8x128xf32>
    %22 = arith.select %9, %20, %21 : vector<8x128xi1>, vector<8x128xf32>
    %c0_12 = arith.constant 0 : index
    %c0_13 = arith.constant 0 : index
    %c0_14 = arith.constant 0 : index
    %23 = vector.load %arg3[%c0_12, %c0_13, %c0_14] : memref<1x8x128xi32, #tpu.memory_space<vmem>>, vector<1x8x128xi32>
    %24 = vector.shape_cast %23 : vector<1x8x128xi32> to vector<8x128xi32>
    %cst_15 = arith.constant 0.000000e+00 : f32
    %25 = vector.broadcast %cst_15 : f32 to vector<8x128xf32>
    %cst_16 = arith.constant 0.000000e+00 : f32
    %26 = vector.broadcast %cst_16 : f32 to vector<8x128xf32>
    %c0_17 = arith.constant 0 : index
    %c0_18 = arith.constant 0 : index
    %c0_19 = arith.constant 0 : index
    %c0_20 = arith.constant 0 : index
    %27 = vector.load %arg2[%c0_17, %c0_18, %c0_19, %c0_20] : memref<1x4x8x128xf32, #tpu.memory_space<vmem>>, vector<1x1x8x128xf32>
    %28 = vector.shape_cast %27 : vector<1x1x8x128xf32> to vector<8x128xf32>
    %cst_21 = arith.constant 0.000000e+00 : f32
    %29 = vector.broadcast %cst_21 : f32 to vector<8x128xf32>
    %30 = arith.select %9, %28, %29 : vector<8x128xi1>, vector<8x128xf32>
    %31 = arith.subf %30, %22 : vector<8x128xf32>
    %32 = math.exp %31 : vector<8x128xf32>
    %33 = arith.addf %25, %32 : vector<8x128xf32>
    %c0_i32 = arith.constant 0 : i32
    %34 = vector.broadcast %c0_i32 : i32 to vector<8x128xi32>
    %35 = arith.cmpi eq, %24, %34 : vector<8x128xi32>
    %36 = arith.select %35, %30, %26 : vector<8x128xi1>, vector<8x128xf32>
    %c0_22 = arith.constant 0 : index
    %c1_23 = arith.constant 1 : index
    %c0_24 = arith.constant 0 : index
    %c0_25 = arith.constant 0 : index
    %37 = vector.load %arg2[%c0_22, %c1_23, %c0_24, %c0_25] : memref<1x4x8x128xf32, #tpu.memory_space<vmem>>, vector<1x1x8x128xf32>
    %38 = vector.shape_cast %37 : vector<1x1x8x128xf32> to vector<8x128xf32>
    %cst_26 = arith.constant 0.000000e+00 : f32
    %39 = vector.broadcast %cst_26 : f32 to vector<8x128xf32>
    %40 = arith.select %9, %38, %39 : vector<8x128xi1>, vector<8x128xf32>
    %41 = arith.subf %40, %22 : vector<8x128xf32>
    %42 = math.exp %41 : vector<8x128xf32>
    %43 = arith.addf %33, %42 : vector<8x128xf32>
    %c1_i32 = arith.constant 1 : i32
    %44 = vector.broadcast %c1_i32 : i32 to vector<8x128xi32>
    %45 = arith.cmpi eq, %24, %44 : vector<8x128xi32>
    %46 = arith.select %45, %40, %36 : vector<8x128xi1>, vector<8x128xf32>
    %c0_27 = arith.constant 0 : index
    %c2_28 = arith.constant 2 : index
    %c0_29 = arith.constant 0 : index
    %c0_30 = arith.constant 0 : index
    %47 = vector.load %arg2[%c0_27, %c2_28, %c0_29, %c0_30] : memref<1x4x8x128xf32, #tpu.memory_space<vmem>>, vector<1x1x8x128xf32>
    %48 = vector.shape_cast %47 : vector<1x1x8x128xf32> to vector<8x128xf32>
    %cst_31 = arith.constant 0.000000e+00 : f32
    %49 = vector.broadcast %cst_31 : f32 to vector<8x128xf32>
    %50 = arith.select %9, %48, %49 : vector<8x128xi1>, vector<8x128xf32>
    %51 = arith.subf %50, %22 : vector<8x128xf32>
    %52 = math.exp %51 : vector<8x128xf32>
    %53 = arith.addf %43, %52 : vector<8x128xf32>
    %c2_i32 = arith.constant 2 : i32
    %54 = vector.broadcast %c2_i32 : i32 to vector<8x128xi32>
    %55 = arith.cmpi eq, %24, %54 : vector<8x128xi32>
    %56 = arith.select %55, %50, %46 : vector<8x128xi1>, vector<8x128xf32>
    %c0_32 = arith.constant 0 : index
    %c3_33 = arith.constant 3 : index
    %c0_34 = arith.constant 0 : index
    %c0_35 = arith.constant 0 : index
    %57 = vector.load %arg2[%c0_32, %c3_33, %c0_34, %c0_35] : memref<1x4x8x128xf32, #tpu.memory_space<vmem>>, vector<1x1x8x128xf32>
    %58 = vector.shape_cast %57 : vector<1x1x8x128xf32> to vector<8x128xf32>
    %cst_36 = arith.constant 0.000000e+00 : f32
    %59 = vector.broadcast %cst_36 : f32 to vector<8x128xf32>
    %60 = arith.select %9, %58, %59 : vector<8x128xi1>, vector<8x128xf32>
    %61 = arith.subf %60, %22 : vector<8x128xf32>
    %62 = math.exp %61 : vector<8x128xf32>
    %63 = arith.addf %53, %62 : vector<8x128xf32>
    %c3_i32 = arith.constant 3 : i32
    %64 = vector.broadcast %c3_i32 : i32 to vector<8x128xi32>
    %65 = arith.cmpi eq, %24, %64 : vector<8x128xi32>
    %66 = arith.select %65, %60, %56 : vector<8x128xi1>, vector<8x128xf32>
    %67 = math.log %63 : vector<8x128xf32>
    %68 = arith.addf %22, %67 : vector<8x128xf32>
    %69 = arith.subf %68, %66 : vector<8x128xf32>
    %cst_37 = arith.constant 0.000000e+00 : f32
    %70 = vector.broadcast %cst_37 : f32 to vector<8x128xf32>
    %71 = arith.select %9, %69, %70 : vector<8x128xi1>, vector<8x128xf32>
    %72 = vector.shape_cast %71 : vector<8x128xf32> to vector<1x8x128xf32>
    %cst_38 = arith.constant dense<0.000000e+00> : vector<8x128xf32>
    %73 = vector.multi_reduction <add>, %72, %cst_38 [0] : vector<1x8x128xf32> to vector<8x128xf32>
    %c0_39 = arith.constant 0 : index
    %c0_40 = arith.constant 0 : index
    %c0_41 = arith.constant 0 : index
    %c0_42 = arith.constant 0 : index
    %74 = vector.load %arg4[%c0_39, %c0_40, %c0_41, %c0_42] : memref<1x1x8x128xf32, #tpu.memory_space<vmem>>, vector<1x1x8x128xf32>
    %75 = vector.shape_cast %74 : vector<1x1x8x128xf32> to vector<8x128xf32>
    %76 = vector.shape_cast %73 : vector<8x128xf32> to vector<1x1x8x128xf32>
    tpu.vector_store %arg4[%c0_39, %c0_40, %c0_41, %c0_42], %76 {strides = array<i32>} : memref<1x1x8x128xf32, #tpu.memory_space<vmem>>, vector<1x1x8x128xf32>,
    return
  }
  func.func @transform_0(%arg0: i32, %arg1: i32) -> (i32, i32, i32, i32) {
    %c0_i32 = arith.constant 0 : i32
    %c0_i32_0 = arith.constant 0 : i32
    %c0_i32_1 = arith.constant 0 : i32
    return %arg0, %c0_i32, %arg1, %c0_i32_0 : i32, i32, i32, i32
  }
  func.func @transform_1(%arg0: i32, %arg1: i32) -> (i32, i32, i32) {
    %c0_i32 = arith.constant 0 : i32
    %c0_i32_0 = arith.constant 0 : i32
    return %arg0, %arg1, %c0_i32 : i32, i32, i32
  }
  func.func @transform_2(%arg0: i32, %arg1: i32) -> (i32, i32, i32, i32) {
    %c0_i32 = arith.constant 0 : i32
    %c0_i32_0 = arith.constant 0 : i32
    %c0_i32_1 = arith.constant 0 : i32
    return %arg0, %arg1, %c0_i32, %c0_i32_0 : i32, i32, i32, i32
  }
}

</mosaic_0001>

<bundles_post_ra>
// kernel: tpu_custom_call.1
= control target key start
LH: loop header
LB: loop body
LE: loop exit
PB: predicated region body
PF: predicated region fallthrough
CT: control target
= control target key end

     0   :  { %7 = vsyncpa [#allocation3], 0  ;;  %s892_s0 = inlined_call_operand.hbm [shape: f32[2,4,8,128], index: 0, kind: input, shape index: {}]   ;;  %s893_s1 = inlined_call_operand.hbm [shape: s32[2,8,128], index: 1, kind: input, shape index: {}]   ;;  %s894_s2 = inlined_call_operand.hbm [shape: f32[2,1,8,128], index: 2, kind: output, shape index: {}]  }
   0x1   :  { %9 = vsyncpa [#allocation3 + $0x1], 0 }
   0x2   :  { %10 = vsyncpa [#allocation6], 0 }
   0x3   :  { %12 = vsyncpa [#allocation6 + $0x1], 0 }
   0x4   :  { %13 = vsyncpa [#allocation4], 0 }
   0x5   :  { %15 = vsyncpa [#allocation4 + $0x1], 0  ;;  %s664_s9 = smov 0   ;;  %s666_s10 = smov 0  }
   0x6   :  { %s668_s11 = smov 0   ;;  %s670_s12 = smov 0  }
   0x7   :  { %s672_s13 = smov 0   ;;  %s674_s14 = smov 0  }
   0x8 LB: > { %s396_s15 = sadd.s32 4294967295, %s642_s14   ;;  %s397_s16 = sadd.s32 4294967294, %s642_s14   ;;  %s642_s14 = sphi %s674_s14, %s21_s14   ;;  %s638_s13 = sphi %s672_s13, %s913_s13   ;;  %s634_s12 = sphi %s670_s12, %s912_s12   ;;  %s630_s11 = sphi %s668_s11, %s911_s11   ;;  %s626_s10 = sphi %s666_s10, %s910_s10   ;;  %s622_s9 = sphi %s664_s9, %s909_s9  }
   0x9   : > { %s33_s17 = sadd.s32 1, %s638_s13  ;;  %s42_s18 = sadd.s32 1, %s630_s11 }
   0xa   : > { %p35_p0 = scmp.ge.s32.totalorder %s33_s17, 2  ;;  %p49_p1 = scmp.ne.s32.totalorder %s630_s11, %s626_s10 }
   0xb   : > { %p50_p2 = scmp.eq.s32.totalorder %s642_s14, 0  ;;  %p55_p3 = scmp.ne.s32.totalorder %s626_s10, %s622_s9 }
   0xc   : > { %s915_s17 = smov (%p35_p0, %s33_s17), 0  ;;  %p56_p5 = scmp.eq.s32.totalorder %s396_s15, 0 }
   0xd   : > { %p705_p4 = por %p50_p2, %p49_p1  ;;  %s37_s20 = ssub.s32 %s638_s13, %s915_s17 }
   0xe   : > { %p109_p6 = scmp.eq.s32.totalorder %s396_s15, 1  ;;  %p40_p7 = scmp.eq.s32.totalorder %s37_s20, 0 }
   0xf   : > { %p711_p8 = por %p56_p5, %p55_p3  ;;  %p115_p10 = scmp.eq.s32.totalorder %s397_s16, 1 }
  0x10   : > { %p715_p9 = por %p109_p6, %p49_p1  ;;  %p434_p13 = scmp.lt.s32.totalorder %s642_s14, 2 }
  0x11   : > { %s898_s21 = scalar_select %p711_p8, 1, 0 }
  0x12   : > { %s899_s22 = scalar_select %p715_p9, 1, 0 }
  0x13   : > { %s720_s23 = scalar_select %p40_p7, %s630_s11, %s42_s18  }
  0x14   : > { %p722_p11 = por %p115_p10, %p55_p3  ;;  %s729_s25 = sand.u32 1, %s630_s11  }
  0x15   : > { %s400_s26 = sshll.u32 %s729_s25, 5  ;;  %s416_s27 = sshll.u32 %s638_s13, 9 }
  0x16   : > { %s900_s24 = scalar_select %p722_p11, 1, 0 }
  0x17   : > { %s736_s30 = scalar_lea.hbm %s892_s0, %s416_s27  ;;  %s139_s3 = scalar_lea.vmem [#allocation2], %s400_s26 }
  0x18   : > { %s147_s4 = sshll.u32 %s139_s3, 4  ;;  %p742_p0 = pnand %p434_p13, %p705_p4  ;;  %s738_s4 = int_to_ptr.vmem [resolvable:$true] %s147_s4 }
  0x19   : > { %s136_s6 = scalar_lea.sflag [#allocation3], %s729_s25  ;;  %s496_s7 = scalar_lea.hbm %s736_s30, 512 }
  0x1a   : > { %p497_p2 = scmp.ne.s32.totalorder %s736_s30, %s496_s7  ;;  %p498_p3 = pneg %p742_p0 }
  0x1b   : > { %s501_s16 = scalar_lea.hbm %s892_s0, 1024  ;;  %p502_p4 = scmp.lt.u32.totalorder %s736_s30, %s892_s0 }
  0x1c   : > { %p499_p5 = pnand %p498_p3, %p497_p2  ;;  %p503_p7 = scmp.lt.u32.totalorder %s501_s16, %s496_s7 }
  0x1d   : > { %p505_p13 = scmp.lt.u32.totalorder %s496_s7, %s736_s30 }
  0x1e   : > { %p500_p6 = pneg %p499_p5  ;;  %p504_p10 = por %p503_p7, %p502_p4 }
  0x20   : > { %p506_p12 = por %p505_p13, %p504_p10 }
  0x22   : > { %p507_p1 = pnand %p506_p12, %p500_p6 }
  0x24   : > { %510 = shalt.err (!%p507_p1)
}
  0x25   : > { %s511_s20 = scalar_lea.vmem %s738_s4, 512  ;;  %s644_s26 = smov [#allocation2]  }
  0x26   : > { %p512_p2 = scmp.ne.s32.totalorder %s738_s4, %s511_s20  ;;  %s516_s27 = sshll.u32 %s644_s26, 4  ;;  %s517_s27 = int_to_ptr.vmem [resolvable:$false] %s516_s27 }
  0x27   : > { %s518_s28 = scalar_lea.vmem %s517_s27, 1024  ;;  %p519_p9 = scmp.lt.s32.totalorder %s738_s4, %s517_s27 }
  0x28   : > { %p514_p5 = pnand %p512_p2, %p498_p3  ;;  %p520_p4 = scmp.lt.s32.totalorder %s518_s28, %s511_s20 }
  0x2a   : > { %p515_p11 = pneg %p514_p5  ;;  %p521_p7 = por %p520_p4, %p519_p9 }
  0x2c   : > { %p522_p10 = pnand %p521_p7, %p515_p11 }
  0x2e   : > { %525 = shalt.err (!%p522_p10)
}
  0x2f   : > { %s645_s29 = smov 128   ;;  %s646_s3 = smov 8  }
  0x30   : > { %426 = dma.hbm_to_vmem [thread:$0]  (!%p742_p0), %s736_s30, 512, %s738_s4, %s136_s6, %s645_s29, %s645_s29, %s646_s3  }
  0x31   : > { %p174_p12 = scmp.lt.s32.totalorder %s642_s14, 3  ;;  %s403_s7 = sshll.u32 %s729_s25, 3 }
  0x32   : > { %s404_s8 = sshll.u32 %s638_s13, 7  ;;  %p902_p9 = scmp.ge.s32.totalorder %s642_s14, 1 }
  0x33   : > { %s787_s19 = scalar_lea.hbm %s893_s1, %s404_s8  ;;  %s161_s20 = scalar_lea.vmem [#allocation5], %s403_s7 }
  0x34   : > { %p780_p11 = pnand %p902_p9, %p174_p12  ;;  %s169_s26 = sshll.u32 %s161_s20, 4  ;;  %s170_s26 = int_to_ptr.vmem [resolvable:$true] %s169_s26 }
  0x35   : > { %s158_s30 = scalar_lea.sflag [#allocation6], %s729_s25  ;;  %s526_s4 = scalar_lea.hbm %s787_s19, 128 }
  0x36   : > { %s903_s15 = scalar_select %p780_p11, 1, 0 }
  0x37   : > { %p527_p1 = scmp.ne.s32.totalorder %s787_s19, %s526_s4  ;;  %s531_s28 = scalar_lea.hbm %s893_s1, 256 }
  0x38   : > { %p532_p2 = scmp.lt.u32.totalorder %s787_s19, %s893_s1  ;;  %p533_p5 = scmp.lt.u32.totalorder %s531_s28, %s526_s4 }
  0x39   : > { %p529_p6 = pnand %p527_p1, %p498_p3  ;;  %p535_p7 = scmp.lt.u32.totalorder %s526_s4, %s787_s19 }
  0x3a   : > { %p534_p4 = por %p533_p5, %p532_p2 }
  0x3b   : > { %p530_p13 = pneg %p529_p6 }
  0x3c   : > { %p536_p10 = por %p535_p7, %p534_p4 }
  0x3e   : > { %p537_p12 = pnand %p536_p10, %p530_p13 }
  0x40   : > { %540 = shalt.err (!%p537_p12)
}
  0x41   : > { %s541_s25 = scalar_lea.vmem %s170_s26, 128  ;;  %s647_s7 = smov [#allocation5]  }
  0x42   : > { %p542_p9 = scmp.ne.s32.totalorder %s170_s26, %s541_s25  ;;  %s546_s8 = sshll.u32 %s647_s7, 4  ;;  %s547_s8 = int_to_ptr.vmem [resolvable:$false] %s546_s8 }
  0x43   : > { %s548_s16 = scalar_lea.vmem %s547_s8, 256  ;;  %p549_p8 = scmp.lt.s32.totalorder %s170_s26, %s547_s8 }
  0x44   : > { %p544_p1 = pnand %p542_p9, %p498_p3  ;;  %p550_p11 = scmp.lt.s32.totalorder %s548_s16, %s541_s25 }
  0x46   : > { %p545_p6 = pneg %p544_p1  ;;  %p551_p2 = por %p550_p11, %p549_p8 }
  0x48   : > { %p552_p5 = pnand %p551_p2, %p545_p6 }
  0x4a   : > { %555 = shalt.err (!%p552_p5)
}
  0x4b   : > { %429 = dma.hbm_to_vmem [thread:$0]  (!%p742_p0), %s787_s19, 128, %s170_s26, %s158_s30  }
  0x4c   : > { %p904_p13 = scmp.ne.s32.totalorder %s903_s15, 0 }
  0x4d   : > { %s812_s18 = sand.u32 (!%p904_p13), 1, %s626_s10   ;;  %p905_p3 = scmp.ne.s32.totalorder (!%p904_p13), %s898_s21, 0 }
  0x4e   : > { %178 = sbr.rel (%p904_p13) target bundleno = 154 (0x9a), region = 28  ;;  %s406_s20 = sshll.u32 (!%p904_p13), %s812_s18, 5 }
  0x4f   : > { %s181_s4 = scalar_lea.sflag (!%p904_p13), [#allocation3], %s812_s18  ;;  %s184_s6 = scalar_lea.vmem (!%p904_p13), [#allocation2], %s406_s20 }
  0x55   : > { %609 = dma.done.wait (%p905_p3), %s181_s4, 512  }
  0x56   : > { %611 = vsyncadd (%p905_p3), %s181_s4, 4294966784  ;;  %s407_s5 = sshll.u32 %s812_s18, 3  ;;  %s190_s15 = scalar_lea.sflag [#allocation6], %s812_s18 }
  0x57   : > { %s824_s19 = scalar_lea.vmem [#allocation5], %s407_s5 }
  0x58   : > { %613 = dma.done.wait (%p905_p3), %s190_s15, 128  }
  0x59   : > { %615 = vsyncadd (%p905_p3), %s190_s15, 4294967168  ;;  %v219_v0 = vlaneseq  ;;  %v229_v5 = vld [vmem:[%s184_s6] sm:$0xff]  ;;  %v409_v6 = vld [vmem:[%s184_s6 + $0x8] sm:$0xff]  ;;  %s218_s21 = scalar_lea.vmem [#allocation7], %s407_s5  ;;  %s413_s30 = sshll.u32 %s634_s12, 7 }
  0x5a   : > { %v410_v7 = vld [vmem:[%s184_s6 + $0x10] sm:$0xff]  ;;  %v232_v8 = vmax.f32 %v229_v5, %v409_v6  ;;  %v411_v9 = vld [vmem:[%s184_s6 + $0x18] sm:$0xff]  ;;  %v240_v31 = vld [vmem:[%s824_s19] sm:$0xff]  ;;  %s291_s26 = sshll.u32 %s218_s21, 4  ;;  %s844_s29 = scalar_lea.hbm %s894_s2, %s413_s30  ;;  %s839_s26 = int_to_ptr.vmem [resolvable:$true] %s291_s26 }
  0x5b   : > { %v220_v1 = vshrl.u32 %v219_v0, 7  ;;  %v225_v2 = vand.u32 127, %v219_v0  ;;  %vm246_vm1 = vcmp.eq.s32.totalorder %v240_v31, 0  ;;  %vm253_vm2 = vcmp.eq.s32.totalorder %v240_v31, 1  ;;  %s277_s3 = scalar_lea.sflag [#allocation4], %s812_s18  ;;  %s556_s25 = scalar_lea.vmem %s839_s26, 128 }
  0x5c   : > { %v235_v10 = vmax.f32 %v232_v8, %v410_v7  ;;  %vm260_vm3 = vcmp.eq.s32.totalorder %v240_v31, 2  ;;  %vm267_vm4 = vcmp.eq.s32.totalorder %v240_v31, 3  ;;  %p557_p8 = scmp.ne.s32.totalorder %s839_s26, %s556_s25  ;;  %p906_p0 = scmp.ne.s32.totalorder %s899_s22, 0 }
  0x5d   : > { %v226_v3 = vmul.u32 128, %v220_v1  ;;  %s648_s12 = smov [#allocation7]  }
  0x5e   : > { %v238_v12 = vmax.f32 %v235_v10, %v411_v9  ;;  %p558_p11 = pnand %p557_p8, %p906_p0  ;;  %s560_s7 = sshll.u32 %s648_s12, 4  ;;  %s561_s7 = int_to_ptr.vmem [resolvable:$false] %s560_s7 }
  0x5f   : > { %v227_v4 = vadd.s32 %v226_v3, %v225_v2  ;;  %s562_s8 = scalar_lea.vmem %s561_s7, 256  ;;  %p563_p7 = scmp.lt.s32.totalorder %s839_s26, %s561_s7 }
  0x60   : > { %p559_p4 = pneg %p558_p11  ;;  %p564_p10 = scmp.lt.s32.totalorder %s562_s8, %s556_s25 }
  0x61   : > { %vm228_vm0 = vcmp.lt.s32.totalorder %v227_v4, 256 }
  0x62   : > { %v241_v11 = vsel %vm228_vm0, %v229_v5, 0.0  ;;  %v248_v13 = vsel %vm228_vm0, %v409_v6, 0.0  ;;  %v255_v14 = vsel %vm228_vm0, %v410_v7, 0.0  ;;  %v262_v15 = vsel %vm228_vm0, %v411_v9, 0.0  ;;  %p565_p12 = por %p564_p10, %p563_p7 }
  0x63   : > { %v239_v16 = vsel %vm228_vm0, %v238_v12, 0.0  ;;  %v247_v33 = vsel %vm246_vm1, %v241_v11, 0.0 }
  0x64   : > { %v242_v17 = vsub.f32 %v241_v11, %v239_v16  ;;  %v249_v18 = vsub.f32 %v248_v13, %v239_v16  ;;  %v256_v19 = vsub.f32 %v255_v14, %v239_v16  ;;  %v263_v20 = vsub.f32 %v262_v15, %v239_v16  ;;  %p566_p9 = pnand %p565_p12, %p559_p4 }
  0x65   : > { %v254_v34 = vsel %vm253_vm2, %v248_v13, %v247_v33 }
  0x66   : > { %v243_v21 = vmul.f32 1.442695, %v242_v17  ;;  %v250_v22 = vmul.f32 1.442695, %v249_v18  ;;  %v257_v23 = vmul.f32 1.442695, %v256_v19  ;;  %v261_v35 = vsel %vm260_vm3, %v255_v14, %v254_v34 }
  0x67   : > { %v264_v24 = vmul.f32 1.442695, %v263_v20  ;;  %v268_v38 = vsel %vm267_vm4, %v262_v15, %v261_v35 }
  0x68   : > { %486 = vpow2.f32 %v243_v21 }
  0x69   : > { %488 = vpow2.f32 %v250_v22 }
  0x6a   : > { %490 = vpow2.f32 %v257_v23 }
  0x6b   : > { %492 = vpow2.f32 %v264_v24 }
  0x72   : > { %v487_v25 = vpop.eup %486 }
  0x73   : > { %v489_v26 = vpop.eup %488 }
  0x74   : > { %v491_v27 = vpop.eup %490  ;;  %v252_v28 = vadd.f32 %v489_v26, %v487_v25 }
  0x75   : > { %v493_v29 = vpop.eup %492 }
  0x76   : > { %v259_v30 = vadd.f32 %v491_v27, %v252_v28 }
  0x78   : > { %v266_v32 = vadd.f32 %v493_v29, %v259_v30 }
  0x7a   : > { %494 = vlog2.f32 %v266_v32 }
  0x84   : > { %v495_v36 = vpop.eup %494 }
  0x85   : > { %v270_v37 = vmul.f32 0.6931472, %v495_v36 }
  0x87   : > { %v271_v39 = vadd.f32 %v270_v37, %v239_v16 }
  0x89   : > { %v272_v40 = vsub.f32 %v271_v39, %v268_v38 }
  0x8b   : > { %v273_v41 = vsel %vm228_vm0, %v272_v40, 0.0 }
  0x8c   : > { %275 = vst [vmem:[%s218_s21] sm:$0xff] %v273_v41 }
  0x8d   : > { %569 = shalt.err (!%p566_p9)
}
  0x8e   : > { %s570_s16 = scalar_lea.hbm %s844_s29, 128  ;;  %s574_s4 = scalar_lea.hbm %s894_s2, 256 }
  0x8f   : > { %p571_p1 = scmp.ne.s32.totalorder %s844_s29, %s570_s16  ;;  %p575_p5 = scmp.lt.u32.totalorder %s844_s29, %s894_s2 }
  0x90   : > { %p576_p13 = scmp.lt.u32.totalorder %s574_s4, %s570_s16  ;;  %p578_p8 = scmp.lt.u32.totalorder %s570_s16, %s844_s29 }
  0x91   : > { %p572_p6 = pnand %p571_p1, %p906_p0 }
  0x92   : > { %p577_p3 = por %p576_p13, %p575_p5 }
  0x93   : > { %p573_p2 = pneg %p572_p6 }
  0x94   : > { %p579_p11 = por %p578_p8, %p577_p3 }
  0x96   : > { %p580_p4 = pnand %p579_p11, %p573_p2 }
  0x98   : > { %583 = shalt.err (!%p580_p4)
}
  0x99   : > { %421 = dma.vmem_to_hbm [thread:$0]  (%p906_p0), %s839_s26, 128, %s844_s29, %s277_s3  }
  0x9a PF: > { %s303_s15 = sand.u32 1, %s622_s9   ;;  %p907_p7 = scmp.ne.s32.totalorder %s900_s24, 0 }
  0x9b   : > { %p908_p10 = scmp.ge.s32.totalorder %s642_s14, 2  ;;  %s304_s19 = scalar_lea.sflag [#allocation4], %s303_s15 }
  0x9d   : > { %p431_p12 = pnand %p908_p10, %p907_p7 }
  0x9f   : > { %617 = dma.done.wait (!%p431_p12), %s304_s19, 128  }
  0xa0   : > { %619 = vsyncadd (!%p431_p12), %s304_s19, 4294967168  ;;  %s21_s14 = sadd.s32 1, %s642_s14   ;;  %s909_s9 = smov %s626_s10 }
  0xa1   : > { %p18_p9 = scmp.ge.s32.totalorder %s21_s14, 4   ;;  %s910_s10 = smov %s630_s11 }
  0xa2   : > { %s911_s11 = smov %s720_s23  ;;  %s912_s12 = smov %s638_s13 }
  0xa3   : > { %s913_s13 = smov %s915_s17  ;;  %20 = sbr.rel (!%p18_p9) target bundleno = 8 (0x8), region = 89 }
  0xaa   :  { %309 = vsyncpa [#allocation3], 1 }
  0xab   :  { %311 = vsyncpa [#allocation3 + $0x1], 1 }
  0xac   :  { %312 = vsyncpa [#allocation6], 1 }
  0xad   :  { %314 = vsyncpa [#allocation6 + $0x1], 1 }
  0xae   :  { %315 = vsyncpa [#allocation4], 1 }
  0xaf   :  { %317 = vsyncpa [#allocation4 + $0x1], 1 }

</bundles_post_ra>
